<compile_context>
chip_gen: v6e
topology: v6e:2x2x1
jax: 0.10.0
libtpu: 0.0.40
codegen_flags: <defaults>
</compile_context>

<pallas_src>
import jax
import jax.numpy as jnp
from jax.experimental import pallas as pl
from jax.experimental.pallas import tpu as pltpu


def _gap_fc_kernel(x_ref, w_ref, b_ref, o_ref):
    # x_ref: (TB, C, HW)   w_ref: (C, Npad)   b_ref: (1, Npad)   o_ref: (TB, Npad)
    inv_hw = 1.0 / float(x_ref.shape[-1])
    # Global average pool == AdaptiveAvgPool2d(1): reduce over the lane (HW) axis,
    # accumulating in f32 without materializing an f32 copy of x.
    pooled = jnp.sum(x_ref[...], axis=-1, dtype=jnp.float32)            # (TB, C)
    w = w_ref[...]                                                      # native dtype
    logits = jnp.dot(pooled.astype(w.dtype), w,
                     preferred_element_type=jnp.float32)                # (TB, Npad)
    # Apply 1/HW after the matmul (N values/row instead of C), then bias.
    logits = logits * inv_hw + b_ref[...].astype(jnp.float32)
    o_ref[...] = logits.astype(o_ref.dtype)


def _round_up(x, m):
    return -(-x // m) * m


def final_layer(x_nchw, weight, bias):
    """x_nchw: (B, C, H, W); weight: (num_classes, C) [torch]; bias: (num_classes,)."""
    B, C, H, W = x_nchw.shape
    N = weight.shape[0]
    HW = H * W

    # Free reshape: keep NCHW layout, HW lands on the lane axis inside the kernel.
    x_bchw = x_nchw.reshape(B, C, HW)

    # Pad num_classes up to a multiple of 128 -> lane-dense output stores, aligned MXU N.
    n_pad = max(128, _round_up(N, 128))
    w_cn = jnp.zeros((C, n_pad), weight.dtype).at[:, :N].set(weight.T)
    b_1n = jnp.zeros((1, n_pad), bias.dtype).at[:, :N].set(bias.reshape(1, N))

    # ---- Choose the batch tile from a VMEM budget (conservative across v5e/v6e/v7x). ----
    itemsize = jnp.dtype(x_nchw.dtype).itemsize
    hw_lanes = _round_up(HW, 128)            # lane padding of a VMEM tile
    c_sub = _round_up(C, 8)                  # sublane padding
    bytes_per_row = c_sub * hw_lanes * itemsize
    per_buffer_budget = 8 * 1024 * 1024      # per input buffer (x is double-buffered)
    tb = max(1, per_buffer_budget // max(bytes_per_row, 1))
    tb = int(min(tb, 128, B))
    if tb < B:
        # Keep the output block's second-to-last dim (TB) a multiple of 8.
        tb = max(8, (tb // 8) * 8)
        b_pad = _round_up(B, tb)
    else:
        tb = B
        b_pad = B
    if b_pad != B:
        x_bchw = jnp.pad(x_bchw, ((0, b_pad - B), (0, 0), (0, 0)))

    grid = (b_pad // tb,)

    # Explicit VMEM limit with headroom (stays within v7x's 64 MiB physical VMEM).
    w_itemsize = jnp.dtype(weight.dtype).itemsize
    est = (2 * tb * bytes_per_row                      # double-buffered x tiles
           + 2 * c_sub * n_pad * w_itemsize            # resident weight
           + 2 * 8 * n_pad * 4                         # bias
           + 2 * _round_up(tb, 8) * n_pad * 4)         # output tiles
    vmem_limit = int(min(max(2 * est, 32 * 1024 * 1024), 48 * 1024 * 1024))

    out = pl.pallas_call(
        _gap_fc_kernel,
        out_shape=jax.ShapeDtypeStruct((b_pad, n_pad), x_nchw.dtype),
        grid_spec=pltpu.PrefetchScalarGridSpec(
            num_scalar_prefetch=0,
            grid=grid,
            in_specs=[
                # Activation: tiled over batch, full C and HW per block.
                pl.BlockSpec((tb, C, HW), lambda i: (i, 0, 0)),
                # Weight / bias: constant block index -> fetched once, resident in VMEM.
                pl.BlockSpec((C, n_pad), lambda i: (0, 0)),
                pl.BlockSpec((1, n_pad), lambda i: (0, 0)),
            ],
            out_specs=pl.BlockSpec((tb, n_pad), lambda i: (i, 0)),
        ),
        compiler_params=pltpu.CompilerParams(
            dimension_semantics=("parallel",),   # shard batch across TCs on v7x
            vmem_limit_bytes=vmem_limit,
        ),
    )(x_bchw, w_cn, b_1n)

    # Slice off batch / class padding before anything downstream (softmax/argmax).
    return out[:B, :N]


if __name__ == "__main__":
    # Small shapes consistent with the module: batch=2, in_channels=4, spatial=16x16, 10 classes.
    B, C, H, W = 2, 4, 16, 16
    NUM_CLASSES = 10

    key = jax.random.PRNGKey(0)
    kx, kw, kb = jax.random.split(key, 3)

    x = jax.random.normal(kx, (B, C, H, W), dtype=jnp.float32)
    # Deterministic Linear init (mimics torch's uniform(-1/sqrt(C), 1/sqrt(C))).
    bound = 1.0 / jnp.sqrt(jnp.float32(C))
    weight = jax.random.uniform(kw, (NUM_CLASSES, C), minval=-bound, maxval=bound,
                                dtype=jnp.float32)
    bias = jax.random.uniform(kb, (NUM_CLASSES,), minval=-bound, maxval=bound,
                              dtype=jnp.float32)

    logits = final_layer(x, weight, bias)
    jax.block_until_ready(logits)

    # Reference check in plain JAX (same math as the PyTorch forward).
    gap_ref = jnp.mean(x, axis=(2, 3))                 # (B, C)
    logits_ref = gap_ref @ weight.T + bias             # (B, NUM_CLASSES)
    assert logits.shape == (B, NUM_CLASSES)
    assert jnp.allclose(logits, logits_ref, atol=1e-5, rtol=1e-5)

    print("KERNEL_OK")
</pallas_src>

<mosaic_0001>
module attributes {stable_mosaic.version = 11 : i64} {
  func.func @_gap_fc_kernel(%arg0: i32, %arg1: memref<2x4x256xf32, #tpu.memory_space<vmem>>, %arg2: memref<4x128xf32, #tpu.memory_space<vmem>>, %arg3: memref<1x128xf32, #tpu.memory_space<vmem>>, %arg4: memref<2x128xf32, #tpu.memory_space<vmem>>) attributes {dimension_semantics = [#tpu.dimension_semantics<parallel>], iteration_bounds = array<i64: 1>, scalar_prefetch = 0 : i64, scratch_operands = 0 : i64, tpu.core_type = #tpu.core_type<tc>, window_params = [{transform_indices = @transform_0, window_bounds = array<i64: 2, 4, 256>}, {pipeline_mode = #tpu.pipeline_mode<synchronous>, transform_indices = @transform_1, window_bounds = array<i64: 4, 128>}, {pipeline_mode = #tpu.pipeline_mode<synchronous>, transform_indices = @transform_2, window_bounds = array<i64: 1, 128>}, {transform_indices = @transform_3, window_bounds = array<i64: 2, 128>}]} {
    %c0 = arith.constant 0 : index
    %c0_0 = arith.constant 0 : index
    %c0_1 = arith.constant 0 : index
    %0 = vector.load %arg1[%c0, %c0_0, %c0_1] : memref<2x4x256xf32, #tpu.memory_space<vmem>>, vector<2x4x256xf32>
    %cst = arith.constant dense<0.000000e+00> : vector<2x4xf32>
    %1 = vector.multi_reduction <add>, %0, %cst [2] : vector<2x4x256xf32> to vector<2x4xf32>
    %c0_2 = arith.constant 0 : index
    %c0_3 = arith.constant 0 : index
    %2 = vector.load %arg2[%c0_2, %c0_3] : memref<4x128xf32, #tpu.memory_space<vmem>>, vector<4x128xf32>
    %cst_4 = arith.constant dense<0.000000e+00> : vector<2x128xf32>
    %3 = tpu.matmul %1, %2, %cst_4 {dimension_numbers = #tpu.dot_dimension_numbers<[1], [0], [0], [1], [0, 0, 1, 1], [], []>} : vector<2x4xf32>, vector<4x128xf32>, vector<2x128xf32> -> vector<2x128xf32>
    %cst_5 = arith.constant 3.906250e-03 : f32
    %4 = vector.broadcast %cst_5 : f32 to vector<2x128xf32>
    %5 = arith.mulf %3, %4 : vector<2x128xf32>
    %c0_6 = arith.constant 0 : index
    %c0_7 = arith.constant 0 : index
    %6 = vector.load %arg3[%c0_6, %c0_7] : memref<1x128xf32, #tpu.memory_space<vmem>>, vector<1x128xf32>
    %7 = vector.broadcast %6 : vector<1x128xf32> to vector<2x128xf32>
    %8 = arith.addf %5, %7 : vector<2x128xf32>
    %c0_8 = arith.constant 0 : index
    %c0_9 = arith.constant 0 : index
    %9 = vector.load %arg4[%c0_8, %c0_9] : memref<2x128xf32, #tpu.memory_space<vmem>>, vector<2x128xf32>
    tpu.vector_store %arg4[%c0_8, %c0_9], %8 {strides = array<i32>} : memref<2x128xf32, #tpu.memory_space<vmem>>, vector<2x128xf32>,
    return
  }
  func.func @transform_0(%arg0: i32) -> (i32, i32, i32) {
    %c0_i32 = arith.constant 0 : i32
    %c0_i32_0 = arith.constant 0 : i32
    %c0_i32_1 = arith.constant 0 : i32
    return %arg0, %c0_i32, %c0_i32_0 : i32, i32, i32
  }
  func.func @transform_1(%arg0: i32) -> (i32, i32) {
    %c0_i32 = arith.constant 0 : i32
    %c0_i32_0 = arith.constant 0 : i32
    %c0_i32_1 = arith.constant 0 : i32
    return %c0_i32, %c0_i32_0 : i32, i32
  }
  func.func @transform_2(%arg0: i32) -> (i32, i32) {
    %c0_i32 = arith.constant 0 : i32
    %c0_i32_0 = arith.constant 0 : i32
    %c0_i32_1 = arith.constant 0 : i32
    return %c0_i32, %c0_i32_0 : i32, i32
  }
  func.func @transform_3(%arg0: i32) -> (i32, i32) {
    %c0_i32 = arith.constant 0 : i32
    %c0_i32_0 = arith.constant 0 : i32
    return %arg0, %c0_i32 : i32, i32
  }
}

</mosaic_0001>

<bundles_post_ra>
// kernel: tpu_custom_call.1
= control target key start
LH: loop header
LB: loop body
LE: loop exit
PB: predicated region body
PF: predicated region fallthrough
CT: control target
= control target key end

     0   :  { %8 = vsyncpa [#allocation3], 0  ;;  %s306_s0 = inlined_call_operand.hbm [shape: f32[2,4,256], index: 0, kind: input, shape index: {}]   ;;  %s307_s1 = inlined_call_operand.hbm [shape: f32[4,128], index: 1, kind: input, shape index: {}]   ;;  %s308_s2 = inlined_call_operand.vmem [shape: f32[1,128], index: 2, kind: input, shape index: {}]   ;;  %s309_s3 = inlined_call_operand.hbm [shape: f32[2,128], index: 3, kind: output, shape index: {}]  }
   0x1   :  { %9 = vsyncpa [#allocation6], 0 }
   0x2   :  { %10 = vsyncpa [#allocation4], 0  ;;  %s262_s12 = smov [#allocation2]  }
   0x3   :  { %s16_s13 = sshll.u32 %s262_s12, 4  ;;  %s17_s13 = int_to_ptr.vmem [resolvable:$true] %s16_s13 }
   0x4   :  { %s204_s14 = scalar_lea.vmem %s17_s13, 256  ;;  %p209_p1 = scmp.lt.s32.totalorder %s17_s13, %s17_s13 }
   0x5   :  { %p205_p0 = scmp.ne.s32.totalorder %s17_s13, %s204_s14  ;;  %p210_p2 = scmp.lt.s32.totalorder %s204_s14, %s204_s14 }
   0x7   :  { %p211_p3 = por %p210_p2, %p209_p1 }
   0x9   :  { %p212_p4 = pnand %p211_p3, %p205_p0 }
   0xb   :  { %215 = shalt.err (!%p212_p4)
}
   0xc   :  { %s263_s15 = smov 128   ;;  %s264_s16 = smov 8  }
   0xd   :  { %22 = dma.hbm_to_vmem [thread:$0]  %s306_s0, 256, %s17_s13, [#allocation3], %s263_s15, %s263_s15, %s264_s16  }
   0xe   :  { %s265_s19 = smov [#allocation5]  }
   0xf   :  { %s29_s20 = sshll.u32 %s265_s19, 4  ;;  %s30_s20 = int_to_ptr.vmem [resolvable:$true] %s29_s20 }
  0x10   :  { %s224_s21 = scalar_lea.vmem %s30_s20, 64  ;;  %p229_p6 = scmp.lt.s32.totalorder %s30_s20, %s30_s20 }
  0x11   :  { %p225_p5 = scmp.ne.s32.totalorder %s30_s20, %s224_s21  ;;  %p230_p7 = scmp.lt.s32.totalorder %s224_s21, %s224_s21 }
  0x13   :  { %p231_p8 = por %p230_p7, %p229_p6 }
  0x15   :  { %p232_p9 = pnand %p231_p8, %p225_p5 }
  0x17   :  { %235 = shalt.err (!%p232_p9)
}
  0x18   :  { %32 = dma.hbm_to_vmem [thread:$0]  %s307_s1, 64, %s30_s20, [#allocation6]  }
  0x19   :  { %256 = dma.done.wait [#allocation3], 256  }
  0x1a   :  { %257 = vsyncadd [#allocation3], 4294967040 }
  0x1b   :  { %258 = dma.done.wait [#allocation6], 64  }
  0x1c   :  { %259 = vsyncadd [#allocation6], 4294967232  ;;  %vm49_vm0 = vcmask 1043456   ;;  %v41_v0 = vld [vmem:[#allocation2] sm:$0xff]  ;;  %v42_v1 = vld [vmem:[#allocation2 + $0x8] sm:$0xff]  ;;  %v266_v11 = vmov 0.0   ;;  %v63_v12 = vlaneseq }
  0x1d   :  { %v45_v2 = vcombine.high %v41_v0, %v41_v0  ;;  %v50_v3 = vsel %vm49_vm0, %v41_v0, 0.0  ;;  %v46_v4 = vcombine.high %v42_v1, %v42_v1  ;;  %v55_v6 = vsel %vm49_vm0, %v42_v1, 0.0  ;;  %v60_v10 = vld [vmem:[#allocation5] sm:$0xf]  ;;  %182 = vmatprep.subr.mxu0 %v266_v11  ;;  %v179_v22 = vld [vmem:[%s308_s2] ss:$0 sm:$0xff] }
  0x1e   :  { %vm267_vm1 = vmmov 0   ;;  %183 = vmatpush3.msk.msra.mxu0 %vm49_vm0, %v60_v10  ;;  %v64_v13 = vand.u32 127, %v63_v12  ;;  %v66_v14 = vshrl.u32 %v63_v12, 7  ;;  %vm73_vm2 = vcmask 1041409   ;;  %s268_s24 = smov [#allocation7]  }
  0x1f   :  { %v51_v5 = vsel %vm49_vm0, %v45_v2, 0.0  ;;  %v56_v7 = vsel %vm49_vm0, %v46_v4, 0.0  ;;  %184 = vmatprep.mubr.msk.f32.mxu0 %vm267_vm1, %v266_v11  ;;  %vm75_vm3 = vcmask 31744   ;;  %s167_s25 = sshll.u32 %s268_s24, 4  ;;  %s168_s25 = int_to_ptr.vmem [resolvable:$true] %s167_s25 }
  0x20   :  { %v52_v8 = vadd.f32 %v51_v5, %v50_v3  ;;  %v57_v9 = vadd.f32 %v56_v7, %v55_v6  ;;  %v67_v16 = vsub.s32 %v64_v13, %v66_v14  ;;  %s236_s26 = scalar_lea.vmem %s168_s25, 32  ;;  %p241_p11 = scmp.lt.s32.totalorder %s168_s25, %s168_s25 }
  0x21   :  { %p237_p10 = scmp.ne.s32.totalorder %s168_s25, %s236_s26  ;;  %p242_p12 = scmp.lt.s32.totalorder %s236_s26, %s236_s26 }
  0x22   :  { %53 = vadd.xlane.f32.xlu0 %v52_v8 }
  0x23   :  { %p243_p13 = por %p242_p12, %p241_p11 }
  0x25   :  { %p244_p0 = pnand %p243_p13, %p237_p10 }
  0x26   :  { %58 = vadd.xlane.f32.xlu0 %v57_v9 }
  0xab   :  { %v54_v15 = vpop.xlane.xlu0 %53 }
  0xac   :  { %v68_v18 = vrot.slane %v54_v15, %v67_v16 }
  0xaf   :  { %v59_v17 = vpop.xlane.xlu0 %58 }
  0xb0   :  { %v72_v19 = vrot.slane %v59_v17, %v67_v16 }
  0xb2   :  { %v74_v20 = vsel %vm73_vm2, %v72_v19, %v68_v18 }
  0xb3   :  { %185 = vmatmul.mubr.msk.f32.vlgmr.msra.gmra.mxu0 %vm75_vm3, %v74_v20 }
 0x173   :  { %v147_v21 = vpop.f32.mrf.mxu0 }
 0x174   :  { %v151_v23 = vmul.f32 0.00390625, %v147_v21 }
 0x175   :  { %v186_v24 = vpop.f32.mrf.mxu0 }
 0x176   :  { %v159_v25 = vadd.f32 %v179_v22, %v151_v23 }
 0x178   :  { %160 = vst [vmem:[#allocation7] sm:$0x3] %v159_v25 }
 0x179   :  { %247 = shalt.err (!%p244_p0)
}
 0x17a   :  { %170 = dma.vmem_to_hbm [thread:$0]  %s168_s25, 32, %s309_s3, [#allocation4]  }
 0x17b   :  { %260 = dma.done.wait [#allocation4], 32  }
 0x17c   :  { %261 = vsyncadd [#allocation4], 4294967264 }
 0x17d   :  { %174 = vsyncpa [#allocation3], 1 }
 0x17e   :  { %175 = vsyncpa [#allocation6], 1 }
 0x17f   :  { %176 = vsyncpa [#allocation4], 1 }

</bundles_post_ra>
